<compile_context>
chip_gen: v7x
topology: tpu7x:2x2x1
jax: 0.10.0
libtpu: 0.0.40
codegen_flags: <defaults>
</compile_context>

<pallas_src>
import math
from functools import partial

import jax
import jax.numpy as jnp
from jax.experimental import pallas as pl
from jax.experimental.pallas import tpu as pltpu


# ----------------------------------------------------------------------------
# Pallas kernels
# ----------------------------------------------------------------------------

def _mm_bn_kernel(relu6, x_ref, w_ref, s_ref, b_ref, o_ref):
    """(tm,K)@(K,N) matmul (bf16 operands, f32 acc) + folded BN (+ReLU6)."""
    y = jnp.dot(x_ref[...], w_ref[...], preferred_element_type=jnp.float32)
    y = y * s_ref[...] + b_ref[...]
    if relu6:
        y = jnp.clip(y, 0.0, 6.0)
    o_ref[...] = y.astype(o_ref.dtype)


def _block_kernel(stride, has_expand, use_res, M, Wo, PAD, hidden, *refs):
    """One whole MobileNetV2 inverted-residual block, fully fused.

    expand 1x1 (+BN+ReLU6) -> depthwise 3x3 (+BN+ReLU6) -> project 1x1 (+BN)
    [+ residual], processing one batch image per grid step with the expanded
    activation resident in VMEM scratch (no HBM round trip between the stages).

    The input arrives pre-split (JAX glue) into stride*stride spatial phases
    (phase (pr,pc) = x[pr::s, pc::s]), so every depthwise tap is a unit-stride
    static slice of a zero-padded per-phase scratch buffer.
    """
    nph = stride * stride
    i = 0
    x_refs = refs[i:i + nph]; i += nph
    if has_expand:
        we_ref, es_ref, eb_ref = refs[i:i + 3]; i += 3
    wd_ref, ds_ref, db_ref = refs[i:i + 3]; i += 3
    wp_ref, ps_ref, pb_ref = refs[i:i + 3]; i += 3
    o_ref = refs[i]; i += 1
    scr_refs = refs[i:i + nph]

    f32 = jnp.float32

    # 1) pointwise expansion (plain copy when expand_ratio == 1) into the
    #    zero-padded per-phase VMEM scratch.
    for p in range(nph):
        x = x_refs[p][0]                                       # (M, C_in)
        if has_expand:
            ex = jnp.dot(x, we_ref[...], preferred_element_type=f32)
            ex = ex * es_ref[...] + eb_ref[...]
            ex = jnp.clip(ex, 0.0, 6.0)
        else:
            ex = x.astype(f32)
        scr_refs[p][...] = jnp.zeros((M + 2 * PAD, hidden), f32)
        scr_refs[p][PAD:PAD + M, :] = ex

    # 2) depthwise 3x3 (pad=1) as 9 shifted unit-stride taps + column masks.
    col = jax.lax.broadcasted_iota(jnp.int32, (M, 1), 0) % Wo
    acc = jnp.zeros((M, hidden), f32)
    for dh in range(3):
        pr = (dh - 1) % stride
        rsh = (dh - 1 - pr) // stride
        for dw in range(3):
            pc = (dw - 1) % stride
            csh = (dw - 1 - pc) // stride
            start = PAD + rsh * Wo + csh
            tap = scr_refs[pr * stride + pc][start:start + M, :]
            if csh == -1:
                tap = jnp.where(col == 0, 0.0, tap)
            elif csh == 1:
                tap = jnp.where(col == Wo - 1, 0.0, tap)
            acc = acc + tap * wd_ref[dh * 3 + dw]
    y = acc * ds_ref[...] + db_ref[...]
    y = jnp.clip(y, 0.0, 6.0)

    # 3) linear projection + BN; residual (if any) is linear and added AFTER
    #    BN with NO activation, matching the PyTorch block.
    out = jnp.dot(y.astype(jnp.bfloat16), wp_ref[...],
                  preferred_element_type=f32)
    out = out * ps_ref[...] + pb_ref[...]
    if use_res:
        out = out + x_refs[0][0].astype(f32)
    o_ref[0] = out.astype(o_ref.dtype)


def _pool_fc_kernel(x_ref, w_ref, b_ref, o_ref):
    """Global average pool (1/(H*W) pre-folded into w) + Linear classifier."""
    pooled = jnp.sum(x_ref[...].astype(jnp.float32), axis=1)      # (N, C)
    y = jnp.dot(pooled, w_ref[...], preferred_element_type=jnp.float32)
    o_ref[...] = (y + b_ref[...]).astype(o_ref.dtype)


# ----------------------------------------------------------------------------
# Pallas wrappers
# ----------------------------------------------------------------------------

def matmul_bn(x, w, scale, bias, relu6=False, tile_m=512):
    """x:(M,K) bf16   w:(K,N) bf16   scale/bias:(1,N) f32 -> (M,N) bf16."""
    M, K = x.shape
    N = w.shape[1]
    tm = M if M <= tile_m else tile_m          # tile_m is a multiple of 8
    grid = (pl.cdiv(M, tm),)
    flops = 2 * M * K * N
    bytes_accessed = (M * K + K * N + M * N) * 2 + 2 * N * 4
    return pl.pallas_call(
        partial(_mm_bn_kernel, relu6),
        out_shape=jax.ShapeDtypeStruct((M, N), jnp.bfloat16),
        grid=grid,
        in_specs=[
            pl.BlockSpec((tm, K), lambda i: (i, 0)),
            pl.BlockSpec((K, N), lambda i: (0, 0)),
            pl.BlockSpec((1, N), lambda i: (0, 0)),
            pl.BlockSpec((1, N), lambda i: (0, 0)),
        ],
        out_specs=pl.BlockSpec((tm, N), lambda i: (i, 0)),
        compiler_params=pltpu.CompilerParams(
            dimension_semantics=("parallel",)),
        cost_estimate=pl.CostEstimate(flops=flops, transcendentals=0,
                                      bytes_accessed=bytes_accessed),
    )(x, w, scale, bias)


def inverted_residual_block(x_nhwc, blk):
    """Fused expand->depthwise->project (+residual) for one block."""
    N, H, W, C_in = x_nhwc.shape
    s = blk['stride']
    assert H % s == 0 and W % s == 0
    Ho = (H + 2 - 3) // s + 1
    Wo = (W + 2 - 3) // s + 1
    M = Ho * Wo
    PAD = ((Wo + 1 + 7) // 8) * 8              # sublane-aligned halo pad
    has_expand = blk['expand'] is not None
    hidden = blk['dw']['w'].shape[-1]
    C_out = blk['proj']['w'].shape[-1]
    use_res = blk['use_res']

    # spatial phase split (glue): phase (pr,pc) = x[:, pr::s, pc::s, :]
    phases = []
    for pr in range(s):
        for pc in range(s):
            phases.append(x_nhwc[:, pr::s, pc::s, :].reshape(N, M, C_in))

    args, in_specs = [], []
    for p in phases:
        args.append(p)
        in_specs.append(pl.BlockSpec((1, M, C_in), lambda b: (b, 0, 0)))
    if has_expand:
        e = blk['expand']
        args += [e['w'], e['scale'], e['bias']]
        in_specs += [pl.BlockSpec((C_in, hidden), lambda b: (0, 0)),
                     pl.BlockSpec((1, hidden), lambda b: (0, 0)),
                     pl.BlockSpec((1, hidden), lambda b: (0, 0))]
    d = blk['dw']
    args += [d['w'], d['scale'], d['bias']]
    in_specs += [pl.BlockSpec((9, 1, hidden), lambda b: (0, 0, 0)),
                 pl.BlockSpec((1, hidden), lambda b: (0, 0)),
                 pl.BlockSpec((1, hidden), lambda b: (0, 0))]
    pj = blk['proj']
    args += [pj['w'], pj['scale'], pj['bias']]
    in_specs += [pl.BlockSpec((hidden, C_out), lambda b: (0, 0)),
                 pl.BlockSpec((1, C_out), lambda b: (0, 0)),
                 pl.BlockSpec((1, C_out), lambda b: (0, 0))]

    scratch = [pltpu.VMEM((M + 2 * PAD, hidden), jnp.float32)
               for _ in range(s * s)]

    exp_flops = 2 * N * (s * s) * M * C_in * hidden if has_expand else 0
    flops = exp_flops + N * (18 * M * hidden + 2 * M * hidden * C_out)
    bytes_accessed = (N * M * (s * s * C_in + C_out) * 2
                      + (C_in * hidden + hidden * C_out) * 2
                      + 9 * hidden * 4 + 6 * hidden * 4 + 2 * C_out * 4)

    out = pl.pallas_call(
        partial(_block_kernel, s, has_expand, use_res, M, Wo, PAD, hidden),
        out_shape=jax.ShapeDtypeStruct((N, M, C_out), jnp.bfloat16),
        grid=(N,),
        in_specs=in_specs,
        out_specs=pl.BlockSpec((1, M, C_out), lambda b: (b, 0, 0)),
        scratch_shapes=scratch,
        compiler_params=pltpu.CompilerParams(
            dimension_semantics=("parallel",)),
        cost_estimate=pl.CostEstimate(flops=flops, transcendentals=0,
                                      bytes_accessed=bytes_accessed),
    )(*args)
    return out.reshape(N, Ho, Wo, C_out)


def pool_linear(x_nhwc, w, b):
    """Global avg pool + Linear.  x:(N,H,W,C) bf16, w:(C,NC) f32, b:(1,NC)."""
    N, H, W, C = x_nhwc.shape
    xr = x_nhwc.reshape(N, H * W, C)
    w_scaled = (w / float(H * W)).astype(jnp.float32)   # fold avg-pool into W
    NC = w.shape[1]
    return pl.pallas_call(
        _pool_fc_kernel,
        out_shape=jax.ShapeDtypeStruct((N, NC), jnp.float32),
        grid=(1,),
        in_specs=[
            pl.BlockSpec((N, H * W, C), lambda i: (0, 0, 0)),
            pl.BlockSpec((C, NC), lambda i: (0, 0)),
            pl.BlockSpec((1, NC), lambda i: (0, 0)),
        ],
        out_specs=pl.BlockSpec((N, NC), lambda i: (0, 0)),
        compiler_params=pltpu.CompilerParams(
            dimension_semantics=("arbitrary",)),
    )(xr, w_scaled, b)


# ----------------------------------------------------------------------------
# Parameter construction (deterministic, mirrors the PyTorch __init__)
# ----------------------------------------------------------------------------

def _make_divisible(v, divisor=8, min_value=None):
    if min_value is None:
        min_value = divisor
    new_v = max(min_value, int(v + divisor / 2) // divisor * divisor)
    if new_v < 0.9 * v:
        new_v += divisor
    return new_v


def _kaiming_conv(key, shape_oihw, groups=1):
    out_c, _, kh, kw = shape_oihw
    fan_out = max(1, out_c * kh * kw // groups)
    std = math.sqrt(2.0 / fan_out)
    return std * jax.random.normal(key, shape_oihw, jnp.float32)


def _bn_fold(c, eps=1e-5):
    # BatchNorm init: gamma=1, beta=0, running_mean=0, running_var=1 (eval)
    gamma = jnp.ones((c,), jnp.float32)
    beta = jnp.zeros((c,), jnp.float32)
    mean = jnp.zeros((c,), jnp.float32)
    var = jnp.ones((c,), jnp.float32)
    scale = gamma / jnp.sqrt(var + eps)
    bias = beta - mean * scale
    return dict(scale=scale.reshape(1, c), bias=bias.reshape(1, c))


def build_mobilenetv2_params(key, num_classes=1, width_mult=1.0, round_nearest=8):
    counter = [0]

    def nk():
        counter[0] += 1
        return jax.random.fold_in(key, counter[0])

    bf16 = jnp.bfloat16
    params = {}
    input_channel = _make_divisible(64 * width_mult, round_nearest)
    last_channel = _make_divisible(1280 * max(1.0, width_mult), round_nearest)

    # stem: Conv2d(1, input_channel, 3, stride=2, pad=1) + BN + ReLU6
    # (weight laid out for im2col; K padded 9 -> 16 so the MXU sees a sublane
    #  multiple instead of a K=9 matmul)
    w = _kaiming_conv(nk(), (input_channel, 1, 3, 3))
    w = jnp.transpose(w, (2, 3, 1, 0)).reshape(9, input_channel)
    w = jnp.pad(w, ((0, 7), (0, 0))).astype(bf16)
    params['stem'] = dict(w=w, **_bn_fold(input_channel))

    settings = [[1, 16, 1, 1], [6, 24, 2, 2], [6, 32, 3, 2], [6, 64, 4, 2],
                [6, 96, 3, 1], [6, 160, 3, 2], [6, 320, 1, 1]]
    blocks = []
    for t, c, n, s in settings:
        out_c = _make_divisible(c * width_mult, round_nearest)
        for i in range(n):
            stride = s if i == 0 else 1
            hidden = int(round(input_channel * t))
            blk = dict(stride=stride,
                       use_res=(stride == 1 and input_channel == out_c))
            if t != 1:
                we = _kaiming_conv(nk(), (hidden, input_channel, 1, 1))
                blk['expand'] = dict(w=we[:, :, 0, 0].T.astype(bf16),
                                     **_bn_fold(hidden))
            else:
                blk['expand'] = None
            wd = _kaiming_conv(nk(), (hidden, 1, 3, 3), groups=hidden)
            # depthwise weights stay f32 (VPU path; v5e has no bf16 VALU)
            blk['dw'] = dict(w=jnp.transpose(wd, (2, 3, 1, 0)).reshape(9, 1, hidden),
                             **_bn_fold(hidden))
            wp = _kaiming_conv(nk(), (out_c, hidden, 1, 1))
            blk['proj'] = dict(w=wp[:, :, 0, 0].T.astype(bf16),
                               **_bn_fold(out_c))
            blocks.append(blk)
            input_channel = out_c
    params['blocks'] = blocks

    # head: 1x1 conv input_channel -> last_channel + BN + ReLU6
    wh = _kaiming_conv(nk(), (last_channel, input_channel, 1, 1))
    params['head'] = dict(w=wh[:, :, 0, 0].T.astype(bf16),
                          **_bn_fold(last_channel))

    # classifier: Linear(last_channel, num_classes), weight ~ N(0, 0.01), bias 0
    wf = 0.01 * jax.random.normal(nk(), (num_classes, last_channel), jnp.float32)
    params['fc'] = dict(w=wf.T, b=jnp.zeros((1, num_classes), jnp.float32))
    return params


# ----------------------------------------------------------------------------
# Forward pass
# ----------------------------------------------------------------------------

def _im2col3x3_k16(x_nhwc, stride):
    """3x3 patches (pad=1) of a 1-channel NHWC image -> (M, 16) bf16 (K padded)."""
    N, H, W, C = x_nhwc.shape
    assert C == 1
    xp = jnp.pad(x_nhwc[..., 0], ((0, 0), (1, 1), (1, 1)))
    Ho = (H + 2 - 3) // stride + 1
    Wo = (W + 2 - 3) // stride + 1
    taps = []
    for kh in range(3):
        for kw in range(3):
            taps.append(xp[:, kh:kh + stride * (Ho - 1) + 1:stride,
                              kw:kw + stride * (Wo - 1) + 1:stride])
    patches = jnp.stack(taps, axis=-1).reshape(N * Ho * Wo, 9)
    patches = jnp.pad(patches, ((0, 0), (0, 7)))          # K: 9 -> 16
    return patches.astype(jnp.bfloat16), (N, Ho, Wo)


def mobilenetv2_forward(x_nchw, params):
    # convert PyTorch NCHW -> NHWC once at entry
    x = jnp.transpose(x_nchw, (0, 2, 3, 1)).astype(jnp.float32)

    # stem: im2col (K padded to 16) + tiled fused matmul/BN/ReLU6 kernel
    patches, (N, Ho, Wo) = _im2col3x3_k16(x, stride=2)
    p = params['stem']
    x = matmul_bn(patches, p['w'], p['scale'], p['bias'],
                  relu6=True).reshape(N, Ho, Wo, -1)

    # inverted-residual stack: one fused Pallas kernel per block
    for blk in params['blocks']:
        x = inverted_residual_block(x, blk)

    # head 1x1 conv + BN + ReLU6 (tiled matmul)
    N, H, W, C = x.shape
    p = params['head']
    x = matmul_bn(x.reshape(N * H * W, C), p['w'], p['scale'], p['bias'],
                  relu6=True).reshape(N, H, W, -1)

    # TODO(synk): nn.Dropout(p=0.2) is identity in eval mode; no RNG applied.
    return pool_linear(x, params['fc']['w'], params['fc']['b'])


# ----------------------------------------------------------------------------
# main
# ----------------------------------------------------------------------------

if __name__ == "__main__":
    key = jax.random.PRNGKey(0)
    k_param, k_input = jax.random.split(key)

    params = build_mobilenetv2_params(k_param, num_classes=1)

    # MobileNetV2 here takes a 1-channel image (stem conv has in_channels=1).
    # 64x64 gives 5 stride-2 stages -> final 2x2 spatial map.
    x = jax.random.normal(k_input, (2, 1, 64, 64), jnp.float32)

    out = mobilenetv2_forward(x, params)
    out = jax.block_until_ready(out)
    assert out.shape == (2, 1), out.shape
    print("KERNEL_OK")
</pallas_src>

<mosaic_0001>
module attributes {stable_mosaic.version = 11 : i64} {
  func.func @_mm_bn_kernel(%arg0: i32, %arg1: memref<512x16xbf16, #tpu.memory_space<vmem>>, %arg2: memref<16x64xbf16, #tpu.memory_space<vmem>>, %arg3: memref<1x64xf32, #tpu.memory_space<vmem>>, %arg4: memref<1x64xf32, #tpu.memory_space<vmem>>, %arg5: memref<512x64xbf16, #tpu.memory_space<vmem>>) attributes {dimension_semantics = [#tpu.dimension_semantics<parallel>], iteration_bounds = array<i64: 4>, scalar_prefetch = 0 : i64, scratch_operands = 0 : i64, tpu.core_type = #tpu.core_type<tc>, window_params = [{transform_indices = @transform_0, window_bounds = array<i64: 512, 16>}, {pipeline_mode = #tpu.pipeline_mode<synchronous>, transform_indices = @transform_1, window_bounds = array<i64: 16, 64>}, {pipeline_mode = #tpu.pipeline_mode<synchronous>, transform_indices = @transform_2, window_bounds = array<i64: 1, 64>}, {pipeline_mode = #tpu.pipeline_mode<synchronous>, transform_indices = @transform_3, window_bounds = array<i64: 1, 64>}, {transform_indices = @transform_4, window_bounds = array<i64: 512, 64>}]} {
    %c0 = arith.constant 0 : index
    %c0_0 = arith.constant 0 : index
    %0 = vector.load %arg1[%c0, %c0_0] : memref<512x16xbf16, #tpu.memory_space<vmem>>, vector<512x16xbf16>
    %c0_1 = arith.constant 0 : index
    %c0_2 = arith.constant 0 : index
    %1 = vector.load %arg2[%c0_1, %c0_2] : memref<16x64xbf16, #tpu.memory_space<vmem>>, vector<16x64xbf16>
    %cst = arith.constant dense<0.000000e+00> : vector<512x64xf32>
    %2 = tpu.matmul %0, %1, %cst {dimension_numbers = #tpu.dot_dimension_numbers<[1], [0], [0], [1], [0, 0, 1, 1], [], []>} : vector<512x16xbf16>, vector<16x64xbf16>, vector<512x64xf32> -> vector<512x64xf32>
    %c0_3 = arith.constant 0 : index
    %c0_4 = arith.constant 0 : index
    %3 = vector.load %arg3[%c0_3, %c0_4] : memref<1x64xf32, #tpu.memory_space<vmem>>, vector<1x64xf32>
    %4 = vector.broadcast %3 : vector<1x64xf32> to vector<512x64xf32>
    %5 = arith.mulf %2, %4 : vector<512x64xf32>
    %c0_5 = arith.constant 0 : index
    %c0_6 = arith.constant 0 : index
    %6 = vector.load %arg4[%c0_5, %c0_6] : memref<1x64xf32, #tpu.memory_space<vmem>>, vector<1x64xf32>
    %7 = vector.broadcast %6 : vector<1x64xf32> to vector<512x64xf32>
    %8 = arith.addf %5, %7 : vector<512x64xf32>
    %cst_7 = arith.constant 0.000000e+00 : f32
    %cst_8 = arith.constant 6.000000e+00 : f32
    %9 = vector.broadcast %cst_7 : f32 to vector<512x64xf32>
    %10 = arith.maximumf %9, %8 : vector<512x64xf32>
    %11 = vector.broadcast %cst_8 : f32 to vector<512x64xf32>
    %12 = arith.minimumf %11, %10 : vector<512x64xf32>
    %13 = arith.truncf %12 : vector<512x64xf32> to vector<512x64xbf16>
    %c0_9 = arith.constant 0 : index
    %c0_10 = arith.constant 0 : index
    %14 = vector.load %arg5[%c0_9, %c0_10] : memref<512x64xbf16, #tpu.memory_space<vmem>>, vector<512x64xbf16>
    tpu.vector_store %arg5[%c0_9, %c0_10], %13 {strides = array<i32>} : memref<512x64xbf16, #tpu.memory_space<vmem>>, vector<512x64xbf16>,
    return
  }
  func.func @transform_0(%arg0: i32) -> (i32, i32) {
    %c0_i32 = arith.constant 0 : i32
    %c0_i32_0 = arith.constant 0 : i32
    return %arg0, %c0_i32 : i32, i32
  }
  func.func @transform_1(%arg0: i32) -> (i32, i32) {
    %c0_i32 = arith.constant 0 : i32
    %c0_i32_0 = arith.constant 0 : i32
    %c0_i32_1 = arith.constant 0 : i32
    return %c0_i32, %c0_i32_0 : i32, i32
  }
  func.func @transform_2(%arg0: i32) -> (i32, i32) {
    %c0_i32 = arith.constant 0 : i32
    %c0_i32_0 = arith.constant 0 : i32
    %c0_i32_1 = arith.constant 0 : i32
    return %c0_i32, %c0_i32_0 : i32, i32
  }
  func.func @transform_3(%arg0: i32) -> (i32, i32) {
    %c0_i32 = arith.constant 0 : i32
    %c0_i32_0 = arith.constant 0 : i32
    %c0_i32_1 = arith.constant 0 : i32
    return %c0_i32, %c0_i32_0 : i32, i32
  }
  func.func @transform_4(%arg0: i32) -> (i32, i32) {
    %c0_i32 = arith.constant 0 : i32
    %c0_i32_0 = arith.constant 0 : i32
    return %arg0, %c0_i32 : i32, i32
  }
}

</mosaic_0001>

<bundles_post_ra>
// kernel: tpu_custom_call.1
= control target key start
LH: loop header
LB: loop body
LE: loop exit
PB: predicated region body
PF: predicated region fallthrough
CT: control target
= control target key end

     0   :  { %s1848_s15 = smov 0   ;;  %s2278_s0 = inlined_call_operand.vmem [shape: bf16[2048,16], index: 0, kind: input, shape index: {}]   ;;  %s2279_s1 = inlined_call_operand.vmem [shape: bf16[16,64], index: 1, kind: input, shape index: {}]   ;;  %s2280_s2 = inlined_call_operand.vmem [shape: f32[1,64], index: 2, kind: input, shape index: {}]   ;;  %s2281_s3 = inlined_call_operand.vmem [shape: f32[1,64], index: 3, kind: input, shape index: {}]   ;;  %s2282_s4 = inlined_call_operand.vmem [shape: bf16[2048,64], index: 4, kind: output, shape index: {}]  }
   0x1 LB: > { %s1467_s16 = sadd.s32 4294967295, %s1821_s15   ;;  %p1471_p0 = scmp.ge.s32.totalorder %s1821_s15, 1  ;;  %s1821_s15 = sphi %s1848_s15, %s14_s15  }
   0x2   : > { %p163_p1 = scmp.lt.s32.totalorder %s1821_s15, 5 }
   0x4   : > { %p164_p2 = pnand %p1471_p0, %p163_p1 }
   0x5   : > { %v1782_v0 = vld [vmem:[%s2279_s1] sm:$0xff] (!%p164_p2)   ;;  %s1472_s19 = sshll.u32 (!%p164_p2), %s1467_s16, 6  ;;  %vm434_vm0 = vcmask (!%p164_p2), 130048   ;;  %vm1346_vm1 = vcmask (!%p164_p2), 519168  }
   0x6   : > { %167 = sbr.rel (%p164_p2) target bundleno = 318 (0x13e), region = 36  ;;  %p190_p3 = scmp.lt.s32.totalorder (!%p164_p2), %s1472_s19, 255  ;;  %1706 = vmatprep.subr.bf16.mxu0 (!%p164_p2), %v1782_v0  ;;  %1772 = vmatprep.subr.bf16.mxu1 (!%p164_p2), %v1782_v0  ;;  %v1936_v33 = vld [vmem:[%s2280_s2] ss:$0 sm:$0xff] (!%p164_p2) }
   0x7   : > { %1707 = vmatpush3.bf16.msra.mxu0 (!%p164_p2), %v1782_v0  ;;  %1773 = vmatpush3.bf16.msra.mxu1 (!%p164_p2), %v1782_v0  ;;  %v1941_v35 = vld [vmem:[%s2281_s3] ss:$0 sm:$0xff] (!%p164_p2) }
   0xd   : > { %s2284_s19 = smov (!%p190_p3, %s1472_s19), 255 }
   0xe   : > { %s1473_s20 = sshll.u32 %s2284_s19, 2 }
   0xf   : > { %s1867_s23 = scalar_lea.vmem %s2278_s0, %s1473_s20  ;;  %s1964_s30 = scalar_lea.vmem %s2282_s4, %s1473_s20 }
  0x10   : > { %v1783_v1 = vld [vmem:[%s1867_s23] sm:$0xff]   ;;  %v1785_v3 = vld [vmem:[%s1867_s23 + $0x8] sm:$0xff]   ;;  %v1787_v5 = vld [vmem:[%s1867_s23 + $0x10] sm:$0xff]  }
  0x11   : > { %v1784_v2 = vld [vmem:[%s1867_s23 + $0x80] sm:$0xff]   ;;  %1708 = vmatprep.mubr.msk.bf16.mxu0 %vm434_vm0, %v1783_v1  ;;  %v1786_v4 = vld [vmem:[%s1867_s23 + $0x88] sm:$0xff]   ;;  %v1788_v6 = vld [vmem:[%s1867_s23 + $0x90] sm:$0xff]  }
  0x12   : > { %1740 = vmatprep.mubr.msk.bf16.mxu1 %vm434_vm0, %v1784_v2  ;;  %1709 = vmatmul.mubr.msk.bf16.vlgmr.msra.gmra.mrb[0].mxu0 %vm434_vm0, %v1785_v3  ;;  %v1789_v7 = vld [vmem:[%s1867_s23 + $0x18] sm:$0xff]   ;;  %v1791_v9 = vld [vmem:[%s1867_s23 + $0x20] sm:$0xff]   ;;  %v1793_v11 = vld [vmem:[%s1867_s23 + $0x28] sm:$0xff]  }
  0x13   : > { %1741 = vmatmul.mubr.msk.bf16.vlgmr.msra.gmra.mrb[0].mxu1 %vm434_vm0, %v1786_v4  ;;  %1712 = vmatprep.mubr.msk.bf16.mxu0 %vm434_vm0, %v1787_v5  ;;  %v1790_v8 = vld [vmem:[%s1867_s23 + $0x98] sm:$0xff]   ;;  %v1792_v10 = vld [vmem:[%s1867_s23 + $0xa0] sm:$0xff]   ;;  %v1794_v12 = vld [vmem:[%s1867_s23 + $0xa8] sm:$0xff]  }
  0x14   : > { %1744 = vmatprep.mubr.msk.bf16.mxu1 %vm434_vm0, %v1788_v6  ;;  %v1795_v13 = vld [vmem:[%s1867_s23 + $0x30] sm:$0xff]   ;;  %v1797_v15 = vld [vmem:[%s1867_s23 + $0x38] sm:$0xff]   ;;  %v1799_v17 = vld [vmem:[%s1867_s23 + $0x40] sm:$0xff]  }
  0x15   : > { %v1796_v14 = vld [vmem:[%s1867_s23 + $0xb0] sm:$0xff]   ;;  %v1798_v16 = vld [vmem:[%s1867_s23 + $0xb8] sm:$0xff]   ;;  %v1800_v18 = vld [vmem:[%s1867_s23 + $0xc0] sm:$0xff]  }
  0x16   : > { %v1801_v19 = vld [vmem:[%s1867_s23 + $0x48] sm:$0xff]   ;;  %v1803_v21 = vld [vmem:[%s1867_s23 + $0x50] sm:$0xff]   ;;  %v1805_v23 = vld [vmem:[%s1867_s23 + $0x58] sm:$0xff]  }
  0x17   : > { %v1802_v20 = vld [vmem:[%s1867_s23 + $0xc8] sm:$0xff]   ;;  %v1804_v22 = vld [vmem:[%s1867_s23 + $0xd0] sm:$0xff]   ;;  %v1806_v24 = vld [vmem:[%s1867_s23 + $0xd8] sm:$0xff]  }
  0x18   : > { %v1807_v25 = vld [vmem:[%s1867_s23 + $0x60] sm:$0xff]   ;;  %v1809_v27 = vld [vmem:[%s1867_s23 + $0x68] sm:$0xff]   ;;  %v1811_v29 = vld [vmem:[%s1867_s23 + $0x70] sm:$0xff]  }
  0x19   : > { %v1808_v26 = vld [vmem:[%s1867_s23 + $0xe0] sm:$0xff]   ;;  %v1810_v28 = vld [vmem:[%s1867_s23 + $0xe8] sm:$0xff]   ;;  %v1812_v30 = vld [vmem:[%s1867_s23 + $0xf0] sm:$0xff]  }
  0x1a   : > { %1713 = vmatmul.mubr.msk.bf16.gmra.mrb[4].mxu0 %vm434_vm0, %v1789_v7  ;;  %v1813_v31 = vld [vmem:[%s1867_s23 + $0x78] sm:$0xff]  }
  0x1b   : > { %1745 = vmatmul.mubr.msk.bf16.gmra.mrb[4].mxu1 %vm434_vm0, %v1790_v8  ;;  %1716 = vmatprep.mubr.msk.bf16.mxu0 %vm434_vm0, %v1791_v9  ;;  %v1814_v32 = vld [vmem:[%s1867_s23 + $0xf8] sm:$0xff]  }
  0x1c   : > { %1748 = vmatprep.mubr.msk.bf16.mxu1 %vm434_vm0, %v1792_v10 }
  0x22   : > { %1717 = vmatmul.mubr.msk.bf16.gmra.mrb[8].mxu0 %vm434_vm0, %v1793_v11 }
  0x23   : > { %1749 = vmatmul.mubr.msk.bf16.gmra.mrb[8].mxu1 %vm434_vm0, %v1794_v12  ;;  %1720 = vmatprep.mubr.msk.bf16.mxu0 %vm434_vm0, %v1795_v13 }
  0x24   : > { %1752 = vmatprep.mubr.msk.bf16.mxu1 %vm434_vm0, %v1796_v14 }
  0x2a   : > { %1721 = vmatmul.mubr.msk.bf16.gmra.mrb[12].mxu0 %vm434_vm0, %v1797_v15 }
  0x2b   : > { %1753 = vmatmul.mubr.msk.bf16.gmra.mrb[12].mxu1 %vm434_vm0, %v1798_v16  ;;  %1724 = vmatprep.mubr.msk.bf16.mxu0 %vm434_vm0, %v1799_v17 }
  0x2c   : > { %1756 = vmatprep.mubr.msk.bf16.mxu1 %vm434_vm0, %v1800_v18 }
  0x32   : > { %1725 = vmatmul.mubr.msk.bf16.gmra.mrb[16].mxu0 %vm434_vm0, %v1801_v19 }
  0x33   : > { %1757 = vmatmul.mubr.msk.bf16.gmra.mrb[16].mxu1 %vm434_vm0, %v1802_v20  ;;  %1728 = vmatprep.mubr.msk.bf16.mxu0 %vm434_vm0, %v1803_v21 }
  0x34   : > { %1760 = vmatprep.mubr.msk.bf16.mxu1 %vm434_vm0, %v1804_v22 }
  0x3a   : > { %1729 = vmatmul.mubr.msk.bf16.gmra.mrb[20].mxu0 %vm434_vm0, %v1805_v23 }
  0x3b   : > { %1761 = vmatmul.mubr.msk.bf16.gmra.mrb[20].mxu1 %vm434_vm0, %v1806_v24  ;;  %1732 = vmatprep.mubr.msk.bf16.mxu0 %vm434_vm0, %v1807_v25 }
  0x3c   : > { %1764 = vmatprep.mubr.msk.bf16.mxu1 %vm434_vm0, %v1808_v26 }
  0x42   : > { %1733 = vmatmul.mubr.msk.bf16.gmra.mrb[24].mxu0 %vm434_vm0, %v1809_v27 }
  0x43   : > { %1765 = vmatmul.mubr.msk.bf16.gmra.mrb[24].mxu1 %vm434_vm0, %v1810_v28  ;;  %1736 = vmatprep.mubr.msk.bf16.mxu0 %vm434_vm0, %v1811_v29 }
  0x44   : > { %1768 = vmatprep.mubr.msk.bf16.mxu1 %vm434_vm0, %v1812_v30 }
  0x4a   : > { %1737 = vmatmul.mubr.msk.bf16.gmra.mrb[28].mxu0 %vm434_vm0, %v1813_v31 }
  0x4b   : > { %1769 = vmatmul.mubr.msk.bf16.gmra.mrb[28].mxu1 %vm434_vm0, %v1814_v32 }
  0xe5   : > { %v1710_v34 = vpop.f32.mrb[0].mxu0 }
  0xe6   : > { %v829_v36 = vmul.f32 %v1710_v34, %v1936_v33  ;;  %v1742_v37 = vpop.f32.mrb[0].mxu1  ;;  %v565_v38 = vpop.f32.mrb[1].mxu0 }
  0xe7   : > { %v861_v39 = vmul.f32 %v1742_v37, %v1936_v33  ;;  %v827_v40 = vmul.f32 %v1936_v33, %v565_v38  ;;  %v693_v41 = vpop.f32.mrb[1].mxu1  ;;  %v1711_v42 = vpop.f32.mrb[2].mxu0 }
  0xe8   : > { %v900_v43 = vadd.f32 %v1941_v35, %v829_v36  ;;  %v859_v44 = vmul.f32 %v1936_v33, %v693_v41  ;;  %v830_v45 = vmul.f32 %v1711_v42, %v1936_v33  ;;  %v1743_v46 = vpop.f32.mrb[2].mxu1  ;;  %v568_v47 = vpop.f32.mrb[3].mxu0 }
  0xe9   : > { %v932_v48 = vadd.f32 %v1941_v35, %v861_v39  ;;  %v898_v49 = vadd.f32 %v1941_v35, %v827_v40  ;;  %v862_v50 = vmul.f32 %v1743_v46, %v1936_v33  ;;  %v828_v51 = vmul.f32 %v1936_v33, %v568_v47  ;;  %v696_v52 = vpop.f32.mrb[3].mxu1 }
  0xea   : > { %v964_v53 = vmax.f32 %v900_v43, 0.0  ;;  %v930_v54 = vadd.f32 %v1941_v35, %v859_v44  ;;  %v901_v55 = vadd.f32 %v1941_v35, %v830_v45  ;;  %v860_v56 = vmul.f32 %v1936_v33, %v696_v52 }
  0xeb   : > { %v996_v57 = vmax.f32 %v932_v48, 0.0  ;;  %v962_v58 = vmax.f32 %v898_v49, 0.0  ;;  %v933_v59 = vadd.f32 %v1941_v35, %v862_v50  ;;  %v899_v60 = vadd.f32 %v1941_v35, %v828_v51 }
  0xec   : > { %v1028_v61 = vmin.f32 %v964_v53, 6.0  ;;  %v994_v62 = vmax.f32 %v930_v54, 0.0  ;;  %v965_v63 = vmax.f32 %v901_v55, 0.0  ;;  %v931_v0 = vadd.f32 %v1941_v35, %v860_v56 }
  0xed   : > { %v1060_v1 = vmin.f32 %v996_v57, 6.0  ;;  %v1026_v2 = vmin.f32 %v962_v58, 6.0  ;;  %v997_v3 = vmax.f32 %v933_v59, 0.0  ;;  %v963_v4 = vmax.f32 %v899_v60, 0.0  ;;  %v1714_v5 = vpop.f32.mrb[4].mxu0 }
  0xee   : > { %v1611_v6 = vpack.c.bf16 %v1028_v61, %v1028_v61  ;;  %v1058_v7 = vmin.f32 %v994_v62, 6.0  ;;  %v1029_v8 = vmin.f32 %v965_v63, 6.0  ;;  %v995_v9 = vmax.f32 %v931_v0, 0.0  ;;  %v1746_v10 = vpop.f32.mrb[4].mxu1  ;;  %v581_v11 = vpop.f32.mrb[5].mxu0 }
  0xef   : > { %v1643_v12 = vpack.c.bf16 %v1060_v1, %v1060_v1  ;;  %v1609_v13 = vpack.c.bf16 %v1026_v2, %v1026_v2  ;;  %v1061_v14 = vmin.f32 %v997_v3, 6.0  ;;  %v1027_v15 = vmin.f32 %v963_v4, 6.0  ;;  %v709_v16 = vpop.f32.mrb[5].mxu1  ;;  %v1715_v17 = vpop.f32.mrb[6].mxu0 }
  0xf0   : > { %1349 = vst.msk [vmem:[%s1964_s30 + $0x8] sm:$0xf] %vm1346_vm1, %v1611_v6  ;;  %v1641_v18 = vpack.c.bf16 %v1058_v7, %v1058_v7  ;;  %v1612_v19 = vpack.c.bf16 %v1029_v8, %v1029_v8  ;;  %v1059_v20 = vmin.f32 %v995_v9, 6.0  ;;  %v833_v21 = vmul.f32 %v1714_v5, %v1936_v33  ;;  %v1747_v22 = vpop.f32.mrb[6].mxu1  ;;  %v584_v23 = vpop.f32.mrb[7].mxu0 }
  0xf1   : > { %1381 = vst.msk [vmem:[%s1964_s30 + $0x88] sm:$0xf] %vm1346_vm1, %v1643_v12  ;;  %1347 = vst.msk [vmem:[%s1964_s30] sm:$0xf] %vm1346_vm1, %v1609_v13  ;;  %v1644_v24 = vpack.c.bf16 %v1061_v14, %v1061_v14  ;;  %v1610_v25 = vpack.c.bf16 %v1027_v15, %v1027_v15  ;;  %v865_v26 = vmul.f32 %v1746_v10, %v1936_v33  ;;  %v712_v28 = vpop.f32.mrb[7].mxu1 }
  0xf2   : > { %v831_v27 = vmul.f32 %v1936_v33, %v581_v11  ;;  %1379 = vst.msk [vmem:[%s1964_s30 + $0x80] sm:$0xf] %vm1346_vm1, %v1641_v18  ;;  %1350 = vst.msk [vmem:[%s1964_s30 + $0xc] sm:$0xf] %vm1346_vm1, %v1612_v19  ;;  %v1642_v29 = vpack.c.bf16 %v1059_v20, %v1059_v20  ;;  %v904_v30 = vadd.f32 %v1941_v35, %v833_v21 }
  0xf3   : > { %v863_v31 = vmul.f32 %v1936_v33, %v709_v16  ;;  %v834_v32 = vmul.f32 %v1715_v17, %v1936_v33  ;;  %1382 = vst.msk [vmem:[%s1964_s30 + $0x8c] sm:$0xf] %vm1346_vm1, %v1644_v24  ;;  %1348 = vst.msk [vmem:[%s1964_s30 + $0x4] sm:$0xf] %vm1346_vm1, %v1610_v25  ;;  %v936_v34 = vadd.f32 %v1941_v35, %v865_v26 }
  0xf4   : > { %v902_v36 = vadd.f32 %v1941_v35, %v831_v27  ;;  %v866_v37 = vmul.f32 %v1747_v22, %v1936_v33  ;;  %v832_v38 = vmul.f32 %v1936_v33, %v584_v23  ;;  %1380 = vst.msk [vmem:[%s1964_s30 + $0x84] sm:$0xf] %vm1346_vm1, %v1642_v29  ;;  %v968_v39 = vmax.f32 %v904_v30, 0.0 }
  0xf5   : > { %v934_v40 = vadd.f32 %v1941_v35, %v863_v31  ;;  %v905_v41 = vadd.f32 %v1941_v35, %v834_v32  ;;  %v864_v42 = vmul.f32 %v1936_v33, %v712_v28  ;;  %v1000_v43 = vmax.f32 %v936_v34, 0.0  ;;  %v1718_v47 = vpop.f32.mrb[8].mxu0 }
  0xf6   : > { %v966_v44 = vmax.f32 %v902_v36, 0.0  ;;  %v937_v45 = vadd.f32 %v1941_v35, %v866_v37  ;;  %v903_v46 = vadd.f32 %v1941_v35, %v832_v38  ;;  %v1032_v48 = vmin.f32 %v968_v39, 6.0  ;;  %v1750_v52 = vpop.f32.mrb[8].mxu1  ;;  %v597_v53 = vpop.f32.mrb[9].mxu0 }
  0xf7   : > { %v998_v49 = vmax.f32 %v934_v40, 0.0  ;;  %v969_v50 = vmax.f32 %v905_v41, 0.0  ;;  %v935_v51 = vadd.f32 %v1941_v35, %v864_v42  ;;  %v1064_v54 = vmin.f32 %v1000_v43, 6.0  ;;  %v725_v58 = vpop.f32.mrb[9].mxu1  ;;  %v1719_v59 = vpop.f32.mrb[10].mxu0 }
  0xf8   : > { %v1030_v55 = vmin.f32 %v966_v44, 6.0  ;;  %v1001_v56 = vmax.f32 %v937_v45, 0.0  ;;  %v967_v57 = vmax.f32 %v903_v46, 0.0  ;;  %v1615_v60 = vpack.c.bf16 %v1032_v48, %v1032_v48  ;;  %v1751_v0 = vpop.f32.mrb[10].mxu1  ;;  %v600_v1 = vpop.f32.mrb[11].mxu0 }
  0xf9   : > { %v1062_v61 = vmin.f32 %v998_v49, 6.0  ;;  %v1033_v62 = vmin.f32 %v969_v50, 6.0  ;;  %v999_v63 = vmax.f32 %v935_v51, 0.0  ;;  %v1647_v2 = vpack.c.bf16 %v1064_v54, %v1064_v54  ;;  %v728_v6 = vpop.f32.mrb[11].mxu1 }
  0xfa   : > { %v1613_v3 = vpack.c.bf16 %v1030_v55, %v1030_v55  ;;  %v1065_v4 = vmin.f32 %v1001_v56, 6.0  ;;  %v1031_v5 = vmin.f32 %v967_v57, 6.0  ;;  %1353 = vst.msk [vmem:[%s1964_s30 + $0x18] sm:$0xf] %vm1346_vm1, %v1615_v60  ;;  %v837_v10 = vmul.f32 %v1718_v47, %v1936_v33 }
  0xfb   : > { %v1645_v7 = vpack.c.bf16 %v1062_v61, %v1062_v61  ;;  %v1616_v8 = vpack.c.bf16 %v1033_v62, %v1033_v62  ;;  %v1063_v9 = vmin.f32 %v999_v63, 6.0  ;;  %1385 = vst.msk [vmem:[%s1964_s30 + $0x98] sm:$0xf] %vm1346_vm1, %v1647_v2  ;;  %v869_v13 = vmul.f32 %v1750_v52, %v1936_v33 }
  0xfc   : > { %1351 = vst.msk [vmem:[%s1964_s30 + $0x10] sm:$0xf] %vm1346_vm1, %v1613_v3  ;;  %v1648_v11 = vpack.c.bf16 %v1065_v4, %v1065_v4  ;;  %v1614_v12 = vpack.c.bf16 %v1031_v5, %v1031_v5  ;;  %v835_v14 = vmul.f32 %v1936_v33, %v597_v53  ;;  %v908_v16 = vadd.f32 %v1941_v35, %v837_v10 }
  0xfd   : > { %1383 = vst.msk [vmem:[%s1964_s30 + $0x90] sm:$0xf] %vm1346_vm1, %v1645_v7  ;;  %1354 = vst.msk [vmem:[%s1964_s30 + $0x1c] sm:$0xf] %vm1346_vm1, %v1616_v8  ;;  %v1646_v15 = vpack.c.bf16 %v1063_v9, %v1063_v9  ;;  %v867_v17 = vmul.f32 %v1936_v33, %v725_v58  ;;  %v838_v18 = vmul.f32 %v1719_v59, %v1936_v33  ;;  %v1722_v23 = vpop.f32.mrb[12].mxu0 }
  0xfe   : > { %1386 = vst.msk [vmem:[%s1964_s30 + $0x9c] sm:$0xf] %vm1346_vm1, %v1648_v11  ;;  %1352 = vst.msk [vmem:[%s1964_s30 + $0x14] sm:$0xf] %vm1346_vm1, %v1614_v12  ;;  %v940_v19 = vadd.f32 %v1941_v35, %v869_v13  ;;  %v906_v20 = vadd.f32 %v1941_v35, %v835_v14  ;;  %v870_v21 = vmul.f32 %v1751_v0, %v1936_v33  ;;  %v972_v24 = vmax.f32 %v908_v16, 0.0  ;;  %v1754_v28 = vpop.f32.mrb[12].mxu1 }
  0xff   : > { %v836_v22 = vmul.f32 %v1936_v33, %v600_v1  ;;  %1384 = vst.msk [vmem:[%s1964_s30 + $0x94] sm:$0xf] %vm1346_vm1, %v1646_v15  ;;  %v938_v25 = vadd.f32 %v1941_v35, %v867_v17  ;;  %v909_v26 = vadd.f32 %v1941_v35, %v838_v18  ;;  %v868_v27 = vmul.f32 %v1936_v33, %v728_v6  ;;  %v613_v29 = vpop.f32.mrb[13].mxu0  ;;  %v741_v36 = vpop.f32.mrb[13].mxu1 }
 0x100   : > { %v1004_v30 = vmax.f32 %v940_v19, 0.0  ;;  %v970_v31 = vmax.f32 %v906_v20, 0.0  ;;  %v941_v32 = vadd.f32 %v1941_v35, %v870_v21  ;;  %v1723_v37 = vpop.f32.mrb[14].mxu0  ;;  %v1036_v38 = vmin.f32 %v972_v24, 6.0  ;;  %v1755_v42 = vpop.f32.mrb[14].mxu1 }
 0x101   : > { %v907_v34 = vadd.f32 %v1941_v35, %v836_v22  ;;  %v1002_v39 = vmax.f32 %v938_v25, 0.0  ;;  %v973_v40 = vmax.f32 %v909_v26, 0.0  ;;  %v939_v41 = vadd.f32 %v1941_v35, %v868_v27  ;;  %v616_v43 = vpop.f32.mrb[15].mxu0  ;;  %v744_v48 = vpop.f32.mrb[15].mxu1 }
 0x102   : > { %v1068_v44 = vmin.f32 %v1004_v30, 6.0  ;;  %v1034_v45 = vmin.f32 %v970_v31, 6.0  ;;  %v1005_v46 = vmax.f32 %v941_v32, 0.0  ;;  %v1619_v49 = vpack.c.bf16 %v1036_v38, %v1036_v38 }
 0x103   : > { %v971_v47 = vmax.f32 %v907_v34, 0.0  ;;  %v1066_v50 = vmin.f32 %v1002_v39, 6.0  ;;  %v1037_v51 = vmin.f32 %v973_v40, 6.0  ;;  %v1003_v52 = vmax.f32 %v939_v41, 0.0 }
 0x104   : > { %v1651_v53 = vpack.c.bf16 %v1068_v44, %v1068_v44  ;;  %v1617_v54 = vpack.c.bf16 %v1034_v45, %v1034_v45  ;;  %v1069_v55 = vmin.f32 %v1005_v46, 6.0  ;;  %1357 = vst.msk [vmem:[%s1964_s30 + $0x28] sm:$0xf] %vm1346_vm1, %v1619_v49  ;;  %v841_v60 = vmul.f32 %v1722_v23, %v1936_v33 }
 0x105   : > { %v1035_v56 = vmin.f32 %v971_v47, 6.0  ;;  %v1649_v57 = vpack.c.bf16 %v1066_v50, %v1066_v50  ;;  %v1620_v58 = vpack.c.bf16 %v1037_v51, %v1037_v51  ;;  %v1067_v59 = vmin.f32 %v1003_v52, 6.0  ;;  %v1726_v1 = vpop.f32.mrb[16].mxu0 }
 0x106   : > { %1389 = vst.msk [vmem:[%s1964_s30 + $0xa8] sm:$0xf] %vm1346_vm1, %v1651_v53  ;;  %1355 = vst.msk [vmem:[%s1964_s30 + $0x20] sm:$0xf] %vm1346_vm1, %v1617_v54  ;;  %v1652_v61 = vpack.c.bf16 %v1069_v55, %v1069_v55  ;;  %v873_v63 = vmul.f32 %v1754_v28, %v1936_v33  ;;  %v839_v0 = vmul.f32 %v1936_v33, %v613_v29  ;;  %v1758_v6 = vpop.f32.mrb[16].mxu1  ;;  %v629_v7 = vpop.f32.mrb[17].mxu0 }
 0x107   : > { %v1618_v62 = vpack.c.bf16 %v1035_v56, %v1035_v56  ;;  %1387 = vst.msk [vmem:[%s1964_s30 + $0xa0] sm:$0xf] %vm1346_vm1, %v1649_v57  ;;  %1358 = vst.msk [vmem:[%s1964_s30 + $0x2c] sm:$0xf] %vm1346_vm1, %v1620_v58  ;;  %v1650_v2 = vpack.c.bf16 %v1067_v59, %v1067_v59  ;;  %v912_v3 = vadd.f32 %v1941_v35, %v841_v60  ;;  %v757_v12 = vpop.f32.mrb[17].mxu1  ;;  %v1727_v13 = vpop.f32.mrb[18].mxu0 }
 0x108   : > { %v871_v4 = vmul.f32 %v1936_v33, %v741_v36  ;;  %v842_v5 = vmul.f32 %v1723_v37, %v1936_v33  ;;  %1390 = vst.msk [vmem:[%s1964_s30 + $0xac] sm:$0xf] %vm1346_vm1, %v1652_v61  ;;  %v944_v8 = vadd.f32 %v1941_v35, %v873_v63  ;;  %v910_v9 = vadd.f32 %v1941_v35, %v839_v0  ;;  %v1759_v18 = vpop.f32.mrb[18].mxu1  ;;  %v632_v19 = vpop.f32.mrb[19].mxu0 }
 0x109   : > { %1356 = vst.msk [vmem:[%s1964_s30 + $0x24] sm:$0xf] %vm1346_vm1, %v1618_v62  ;;  %v874_v10 = vmul.f32 %v1755_v42, %v1936_v33  ;;  %v840_v11 = vmul.f32 %v1936_v33, %v616_v43  ;;  %1388 = vst.msk [vmem:[%s1964_s30 + $0xa4] sm:$0xf] %vm1346_vm1, %v1650_v2  ;;  %v976_v14 = vmax.f32 %v912_v3, 0.0  ;;  %v872_v17 = vmul.f32 %v1936_v33, %v744_v48  ;;  %v760_v24 = vpop.f32.mrb[19].mxu1 }
 0x10a   : > { %v942_v15 = vadd.f32 %v1941_v35, %v871_v4  ;;  %v913_v16 = vadd.f32 %v1941_v35, %v842_v5  ;;  %v1008_v20 = vmax.f32 %v944_v8, 0.0  ;;  %v974_v21 = vmax.f32 %v910_v9, 0.0 }
 0x10b   : > { %v945_v22 = vadd.f32 %v1941_v35, %v874_v10  ;;  %v911_v23 = vadd.f32 %v1941_v35, %v840_v11  ;;  %v1040_v25 = vmin.f32 %v976_v14, 6.0  ;;  %v943_v28 = vadd.f32 %v1941_v35, %v872_v17 }
 0x10c   : > { %v1006_v26 = vmax.f32 %v942_v15, 0.0  ;;  %v977_v27 = vmax.f32 %v913_v16, 0.0  ;;  %v1072_v29 = vmin.f32 %v1008_v20, 6.0  ;;  %v1038_v30 = vmin.f32 %v974_v21, 6.0 }
 0x10d   : > { %v1009_v31 = vmax.f32 %v945_v22, 0.0  ;;  %v975_v32 = vmax.f32 %v911_v23, 0.0  ;;  %v1623_v34 = vpack.c.bf16 %v1040_v25, %v1040_v25  ;;  %v1007_v38 = vmax.f32 %v943_v28, 0.0  ;;  %v2062_v43 = vpop.f32.mrb[20].mxu0 }
 0x10e   : > { %v1070_v36 = vmin.f32 %v1006_v26, 6.0  ;;  %v1041_v37 = vmin.f32 %v977_v27, 6.0  ;;  %v1655_v39 = vpack.c.bf16 %v1072_v29, %v1072_v29  ;;  %v1621_v40 = vpack.c.bf16 %v1038_v30, %v1038_v30  ;;  %v2067_v48 = vpop.f32.mrb[20].mxu1  ;;  %v2069_v49 = vpop.f32.mrb[21].mxu0 }
 0x10f   : > { %v1073_v41 = vmin.f32 %v1009_v31, 6.0  ;;  %v1039_v42 = vmin.f32 %v975_v32, 6.0  ;;  %1361 = vst.msk [vmem:[%s1964_s30 + $0x38] sm:$0xf] %vm1346_vm1, %v1623_v34  ;;  %v1071_v46 = vmin.f32 %v1007_v38, 6.0  ;;  %v845_v47 = vmul.f32 %v1726_v1, %v1936_v33  ;;  %v2077_v54 = vpop.f32.mrb[21].mxu1 }
 0x110   : > { %v1653_v44 = vpack.c.bf16 %v1070_v36, %v1070_v36  ;;  %v1624_v45 = vpack.c.bf16 %v1041_v37, %v1041_v37  ;;  %1393 = vst.msk [vmem:[%s1964_s30 + $0xb8] sm:$0xf] %vm1346_vm1, %v1655_v39  ;;  %1359 = vst.msk [vmem:[%s1964_s30 + $0x30] sm:$0xf] %vm1346_vm1, %v1621_v40  ;;  %v877_v52 = vmul.f32 %v1758_v6, %v1936_v33  ;;  %v2079_v55 = vpop.f32.mrb[22].mxu0  ;;  %v2088_v60 = vpop.f32.mrb[22].mxu1 }
 0x111   : > { %v1656_v50 = vpack.c.bf16 %v1073_v41, %v1073_v41  ;;  %v1622_v51 = vpack.c.bf16 %v1039_v42, %v1039_v42  ;;  %v843_v53 = vmul.f32 %v1936_v33, %v629_v7  ;;  %v1654_v56 = vpack.c.bf16 %v1071_v46, %v1071_v46  ;;  %v2090_v61 = vpop.f32.mrb[23].mxu0  ;;  %v776_v2 = vpop.f32.mrb[23].mxu1 }
 0x112   : > { %1391 = vst.msk [vmem:[%s1964_s30 + $0xb0] sm:$0xf] %vm1346_vm1, %v1653_v44  ;;  %1362 = vst.msk [vmem:[%s1964_s30 + $0x3c] sm:$0xf] %vm1346_vm1, %v1624_v45  ;;  %v916_v57 = vadd.f32 %v1941_v35, %v845_v47  ;;  %v875_v58 = vmul.f32 %v1936_v33, %v757_v12  ;;  %v846_v59 = vmul.f32 %v1727_v13, %v1936_v33 }
 0x113   : > { %1394 = vst.msk [vmem:[%s1964_s30 + $0xbc] sm:$0xf] %vm1346_vm1, %v1656_v50  ;;  %1360 = vst.msk [vmem:[%s1964_s30 + $0x34] sm:$0xf] %vm1346_vm1, %v1622_v51  ;;  %v948_v62 = vadd.f32 %v1941_v35, %v877_v52  ;;  %v914_v63 = vadd.f32 %v1941_v35, %v843_v53  ;;  %v878_v0 = vmul.f32 %v1759_v18, %v1936_v33 }
 0x114   : > { %v844_v1 = vmul.f32 %v1936_v33, %v632_v19  ;;  %1392 = vst.msk [vmem:[%s1964_s30 + $0xb4] sm:$0xf] %vm1346_vm1, %v1654_v56  ;;  %v980_v3 = vmax.f32 %v916_v57, 0.0  ;;  %v946_v4 = vadd.f32 %v1941_v35, %v875_v58  ;;  %v917_v5 = vadd.f32 %v1941_v35, %v846_v59 }
 0x115   : > { %v876_v6 = vmul.f32 %v1936_v33, %v760_v24  ;;  %v1012_v7 = vmax.f32 %v948_v62, 0.0  ;;  %v978_v8 = vmax.f32 %v914_v63, 0.0  ;;  %v949_v9 = vadd.f32 %v1941_v35, %v878_v0  ;;  %v2108_v19 = vpop.f32.mrb[24].mxu0 }
 0x116   : > { %v915_v10 = vadd.f32 %v1941_v35, %v844_v1  ;;  %v1044_v11 = vmin.f32 %v980_v3, 6.0  ;;  %v1010_v12 = vmax.f32 %v946_v4, 0.0  ;;  %v981_v13 = vmax.f32 %v917_v5, 0.0  ;;  %v2110_v24 = vpop.f32.mrb[24].mxu1  ;;  %v2112_v25 = vpop.f32.mrb[25].mxu0 }
 0x117   : > { %v947_v14 = vadd.f32 %v1941_v35, %v876_v6  ;;  %v1076_v15 = vmin.f32 %v1012_v7, 6.0  ;;  %v1042_v16 = vmin.f32 %v978_v8, 6.0  ;;  %v1013_v17 = vmax.f32 %v949_v9, 0.0  ;;  %v2114_v30 = vpop.f32.mrb[25].mxu1  ;;  %v2116_v31 = vpop.f32.mrb[26].mxu0 }
 0x118   : > { %v979_v18 = vmax.f32 %v915_v10, 0.0  ;;  %v1627_v20 = vpack.c.bf16 %v1044_v11, %v1044_v11  ;;  %v1074_v21 = vmin.f32 %v1010_v12, 6.0  ;;  %v1045_v22 = vmin.f32 %v981_v13, 6.0  ;;  %v2122_v38 = vpop.f32.mrb[26].mxu1  ;;  %v2124_v39 = vpop.f32.mrb[27].mxu0 }
 0x119   : > { %v1011_v23 = vmax.f32 %v947_v14, 0.0  ;;  %v1659_v26 = vpack.c.bf16 %v1076_v15, %v1076_v15  ;;  %v1625_v27 = vpack.c.bf16 %v1042_v16, %v1042_v16  ;;  %v1077_v28 = vmin.f32 %v1013_v17, 6.0 }
 0x11a   : > { %v1043_v29 = vmin.f32 %v979_v18, 6.0  ;;  %1365 = vst.msk [vmem:[%s1964_s30 + $0x48] sm:$0xf] %vm1346_vm1, %v1627_v20  ;;  %v1657_v32 = vpack.c.bf16 %v1074_v21, %v1074_v21  ;;  %v1628_v34 = vpack.c.bf16 %v1045_v22, %v1045_v22  ;;  %v849_v37 = vmul.f32 %v2062_v43, %v1936_v33  ;;  %v2134_v43 = vpop.f32.mrb[27].mxu1 }
 0x11b   : > { %v1075_v36 = vmin.f32 %v1011_v23, 6.0  ;;  %1397 = vst.msk [vmem:[%s1964_s30 + $0xc8] sm:$0xf] %vm1346_vm1, %v1659_v26  ;;  %1363 = vst.msk [vmem:[%s1964_s30 + $0x40] sm:$0xf] %vm1346_vm1, %v1625_v27  ;;  %v1660_v40 = vpack.c.bf16 %v1077_v28, %v1077_v28  ;;  %v881_v42 = vmul.f32 %v2067_v48, %v1936_v33  ;;  %v847_v44 = vmul.f32 %v1936_v33, %v2069_v49 }
 0x11c   : > { %v1626_v41 = vpack.c.bf16 %v1043_v29, %v1043_v29  ;;  %1395 = vst.msk [vmem:[%s1964_s30 + $0xc0] sm:$0xf] %vm1346_vm1, %v1657_v32  ;;  %1366 = vst.msk [vmem:[%s1964_s30 + $0x4c] sm:$0xf] %vm1346_vm1, %v1628_v34  ;;  %v920_v46 = vadd.f32 %v1941_v35, %v849_v37  ;;  %v879_v47 = vmul.f32 %v1936_v33, %v2077_v54 }
 0x11d   : > { %v1658_v45 = vpack.c.bf16 %v1075_v36, %v1075_v36  ;;  %v850_v50 = vmul.f32 %v2079_v55, %v1936_v33  ;;  %1398 = vst.msk [vmem:[%s1964_s30 + $0xcc] sm:$0xf] %vm1346_vm1, %v1660_v40  ;;  %v952_v48 = vadd.f32 %v1941_v35, %v881_v42  ;;  %v918_v49 = vadd.f32 %v1941_v35, %v847_v44  ;;  %v2162_v63 = vpop.f32.mrb[28].mxu0 }
 0x11e   : > { %1364 = vst.msk [vmem:[%s1964_s30 + $0x44] sm:$0xf] %vm1346_vm1, %v1626_v41  ;;  %v882_v51 = vmul.f32 %v2088_v60, %v1936_v33  ;;  %v848_v52 = vmul.f32 %v1936_v33, %v2090_v61  ;;  %v984_v53 = vmax.f32 %v920_v46, 0.0  ;;  %v950_v54 = vadd.f32 %v1941_v35, %v879_v47  ;;  %v2165_v3 = vpop.f32.mrb[28].mxu1  ;;  %v2167_v4 = vpop.f32.mrb[29].mxu0 }
 0x11f   : > { %1396 = vst.msk [vmem:[%s1964_s30 + $0xc4] sm:$0xf] %vm1346_vm1, %v1658_v45  ;;  %v921_v55 = vadd.f32 %v1941_v35, %v850_v50  ;;  %v880_v56 = vmul.f32 %v1936_v33, %v776_v2  ;;  %v1016_v57 = vmax.f32 %v952_v48, 0.0  ;;  %v982_v58 = vmax.f32 %v918_v49, 0.0  ;;  %v2169_v8 = vpop.f32.mrb[29].mxu1  ;;  %v2171_v9 = vpop.f32.mrb[30].mxu0 }
 0x120   : > { %v953_v59 = vadd.f32 %v1941_v35, %v882_v51  ;;  %v919_v62 = vadd.f32 %v1941_v35, %v848_v52  ;;  %v1048_v60 = vmin.f32 %v984_v53, 6.0  ;;  %v1014_v0 = vmax.f32 %v950_v54, 0.0  ;;  %v2173_v14 = vpop.f32.mrb[30].mxu1  ;;  %v2175_v15 = vpop.f32.mrb[31].mxu0 }
 0x121   : > { %v985_v61 = vmax.f32 %v921_v55, 0.0  ;;  %v951_v1 = vadd.f32 %v1941_v35, %v880_v56  ;;  %v1080_v5 = vmin.f32 %v1016_v57, 6.0  ;;  %v1046_v6 = vmin.f32 %v982_v58, 6.0  ;;  %v2177_v21 = vpop.f32.mrb[31].mxu1 }
 0x122   : > { %v1017_v2 = vmax.f32 %v953_v59, 0.0  ;;  %v983_v7 = vmax.f32 %v919_v62, 0.0  ;;  %v1631_v10 = vpack.c.bf16 %v1048_v60, %v1048_v60  ;;  %v1078_v11 = vmin.f32 %v1014_v0, 6.0 }
 0x123   : > { %v1049_v12 = vmin.f32 %v985_v61, 6.0  ;;  %v1015_v13 = vmax.f32 %v951_v1, 0.0  ;;  %v1663_v16 = vpack.c.bf16 %v1080_v5, %v1080_v5  ;;  %v1629_v17 = vpack.c.bf16 %v1046_v6, %v1046_v6 }
 0x124   : > { %v1081_v18 = vmin.f32 %v1017_v2, 6.0  ;;  %v1047_v20 = vmin.f32 %v983_v7, 6.0  ;;  %1369 = vst.msk [vmem:[%s1964_s30 + $0x58] sm:$0xf] %vm1346_vm1, %v1631_v10  ;;  %v1661_v22 = vpack.c.bf16 %v1078_v11, %v1078_v11  ;;  %v853_v27 = vmul.f32 %v2108_v19, %v1936_v33 }
 0x125   : > { %v1632_v23 = vpack.c.bf16 %v1049_v12, %v1049_v12  ;;  %v1079_v26 = vmin.f32 %v1015_v13, 6.0  ;;  %1401 = vst.msk [vmem:[%s1964_s30 + $0xd8] sm:$0xf] %vm1346_vm1, %v1663_v16  ;;  %1367 = vst.msk [vmem:[%s1964_s30 + $0x50] sm:$0xf] %vm1346_vm1, %v1629_v17  ;;  %v885_v32 = vmul.f32 %v2110_v24, %v1936_v33  ;;  %v851_v34 = vmul.f32 %v1936_v33, %v2112_v25 }
 0x126   : > { %v1664_v28 = vpack.c.bf16 %v1081_v18, %v1081_v18  ;;  %v1630_v29 = vpack.c.bf16 %v1047_v20, %v1047_v20  ;;  %1399 = vst.msk [vmem:[%s1964_s30 + $0xd0] sm:$0xf] %vm1346_vm1, %v1661_v22  ;;  %v924_v19 = vadd.f32 %v1941_v35, %v853_v27  ;;  %v883_v37 = vmul.f32 %v1936_v33, %v2114_v30 }
 0x127   : > { %1370 = vst.msk [vmem:[%s1964_s30 + $0x5c] sm:$0xf] %vm1346_vm1, %v1632_v23  ;;  %v1662_v36 = vpack.c.bf16 %v1079_v26, %v1079_v26  ;;  %v854_v40 = vmul.f32 %v2116_v31, %v1936_v33  ;;  %v956_v24 = vadd.f32 %v1941_v35, %v885_v32  ;;  %v922_v25 = vadd.f32 %v1941_v35, %v851_v34 }
 0x128   : > { %1402 = vst.msk [vmem:[%s1964_s30 + $0xdc] sm:$0xf] %vm1346_vm1, %v1664_v28  ;;  %1368 = vst.msk [vmem:[%s1964_s30 + $0x54] sm:$0xf] %vm1346_vm1, %v1630_v29  ;;  %v886_v41 = vmul.f32 %v2122_v38, %v1936_v33  ;;  %v852_v42 = vmul.f32 %v1936_v33, %v2124_v39  ;;  %v988_v30 = vmax.f32 %v924_v19, 0.0  ;;  %v954_v44 = vadd.f32 %v1941_v35, %v883_v37 }
 0x129   : > { %1400 = vst.msk [vmem:[%s1964_s30 + $0xd4] sm:$0xf] %vm1346_vm1, %v1662_v36  ;;  %v925_v31 = vadd.f32 %v1941_v35, %v854_v40  ;;  %v884_v45 = vmul.f32 %v1936_v33, %v2134_v43  ;;  %v1020_v46 = vmax.f32 %v956_v24, 0.0  ;;  %v986_v47 = vmax.f32 %v922_v25, 0.0 }
 0x12a   : > { %v957_v50 = vadd.f32 %v1941_v35, %v886_v41  ;;  %v923_v48 = vadd.f32 %v1941_v35, %v852_v42  ;;  %v1052_v38 = vmin.f32 %v988_v30, 6.0  ;;  %v1018_v49 = vmax.f32 %v954_v44, 0.0 }
 0x12b   : > { %v989_v39 = vmax.f32 %v925_v31, 0.0  ;;  %v955_v51 = vadd.f32 %v1941_v35, %v884_v45  ;;  %v1084_v52 = vmin.f32 %v1020_v46, 6.0  ;;  %v1050_v53 = vmin.f32 %v986_v47, 6.0 }
 0x12c   : > { %v1021_v54 = vmax.f32 %v957_v50, 0.0  ;;  %v987_v55 = vmax.f32 %v923_v48, 0.0  ;;  %v1635_v56 = vpack.c.bf16 %v1052_v38, %v1052_v38  ;;  %v1082_v43 = vmin.f32 %v1018_v49, 6.0 }
 0x12d   : > { %v1053_v57 = vmin.f32 %v989_v39, 6.0  ;;  %v1019_v58 = vmax.f32 %v955_v51, 0.0  ;;  %v1667_v59 = vpack.c.bf16 %v1084_v52, %v1084_v52  ;;  %v1633_v62 = vpack.c.bf16 %v1050_v53, %v1050_v53 }
 0x12e   : > { %v1085_v60 = vmin.f32 %v1021_v54, 6.0  ;;  %v1051_v0 = vmin.f32 %v987_v55, 6.0  ;;  %1373 = vst.msk [vmem:[%s1964_s30 + $0x68] sm:$0xf] %vm1346_vm1, %v1635_v56  ;;  %v1665_v61 = vpack.c.bf16 %v1082_v43, %v1082_v43  ;;  %v857_v6 = vmul.f32 %v2162_v63, %v1936_v33 }
 0x12f   : > { %v1636_v1 = vpack.c.bf16 %v1053_v57, %v1053_v57  ;;  %v1083_v5 = vmin.f32 %v1019_v58, 6.0  ;;  %1405 = vst.msk [vmem:[%s1964_s30 + $0xe8] sm:$0xf] %vm1346_vm1, %v1667_v59  ;;  %1371 = vst.msk [vmem:[%s1964_s30 + $0x60] sm:$0xf] %vm1346_vm1, %v1633_v62  ;;  %v889_v10 = vmul.f32 %v2165_v3, %v1936_v33  ;;  %v855_v11 = vmul.f32 %v1936_v33, %v2167_v4 }
 0x130   : > { %v1668_v2 = vpack.c.bf16 %v1085_v60, %v1085_v60  ;;  %v1634_v7 = vpack.c.bf16 %v1051_v0, %v1051_v0  ;;  %1403 = vst.msk [vmem:[%s1964_s30 + $0xe0] sm:$0xf] %vm1346_vm1, %v1665_v61  ;;  %v928_v63 = vadd.f32 %v1941_v35, %v857_v6  ;;  %v887_v13 = vmul.f32 %v1936_v33, %v2169_v8 }
 0x131   : > { %1374 = vst.msk [vmem:[%s1964_s30 + $0x6c] sm:$0xf] %vm1346_vm1, %v1636_v1  ;;  %v1666_v12 = vpack.c.bf16 %v1083_v5, %v1083_v5  ;;  %v858_v16 = vmul.f32 %v2171_v9, %v1936_v33  ;;  %v960_v3 = vadd.f32 %v1941_v35, %v889_v10  ;;  %v926_v4 = vadd.f32 %v1941_v35, %v855_v11 }
 0x132   : > { %1406 = vst.msk [vmem:[%s1964_s30 + $0xec] sm:$0xf] %vm1346_vm1, %v1668_v2  ;;  %1372 = vst.msk [vmem:[%s1964_s30 + $0x64] sm:$0xf] %vm1346_vm1, %v1634_v7  ;;  %v890_v17 = vmul.f32 %v2173_v14, %v1936_v33  ;;  %v856_v18 = vmul.f32 %v1936_v33, %v2175_v15  ;;  %v992_v8 = vmax.f32 %v928_v63, 0.0  ;;  %v958_v20 = vadd.f32 %v1941_v35, %v887_v13 }
 0x133   : > { %1404 = vst.msk [vmem:[%s1964_s30 + $0xe4] sm:$0xf] %vm1346_vm1, %v1666_v12  ;;  %v929_v9 = vadd.f32 %v1941_v35, %v858_v16  ;;  %v888_v22 = vmul.f32 %v1936_v33, %v2177_v21  ;;  %v1024_v23 = vmax.f32 %v960_v3, 0.0  ;;  %v990_v26 = vmax.f32 %v926_v4, 0.0 }
 0x134   : > { %v961_v27 = vadd.f32 %v1941_v35, %v890_v17  ;;  %v927_v28 = vadd.f32 %v1941_v35, %v856_v18  ;;  %v1056_v14 = vmin.f32 %v992_v8, 6.0  ;;  %v1022_v29 = vmax.f32 %v958_v20, 0.0 }
 0x135   : > { %v993_v15 = vmax.f32 %v929_v9, 0.0  ;;  %v959_v32 = vadd.f32 %v1941_v35, %v888_v22  ;;  %v1088_v34 = vmin.f32 %v1024_v23, 6.0  ;;  %v1054_v36 = vmin.f32 %v990_v26, 6.0 }
 0x136   : > { %v1025_v19 = vmax.f32 %v961_v27, 0.0  ;;  %v991_v37 = vmax.f32 %v927_v28, 0.0  ;;  %v1639_v40 = vpack.c.bf16 %v1056_v14, %v1056_v14  ;;  %v1086_v33 = vmin.f32 %v1022_v29, 6.0 }
 0x137   : > { %v1057_v21 = vmin.f32 %v993_v15, 6.0  ;;  %v1023_v24 = vmax.f32 %v959_v32, 0.0  ;;  %v1671_v25 = vpack.c.bf16 %v1088_v34, %v1088_v34  ;;  %v1637_v41 = vpack.c.bf16 %v1054_v36, %v1054_v36 }
 0x138   : > { %v1089_v42 = vmin.f32 %v1025_v19, 6.0  ;;  %v1055_v30 = vmin.f32 %v991_v37, 6.0  ;;  %1377 = vst.msk [vmem:[%s1964_s30 + $0x78] sm:$0xf] %vm1346_vm1, %v1639_v40  ;;  %v1669_v35 = vpack.c.bf16 %v1086_v33, %v1086_v33 }
 0x139   : > { %v1640_v44 = vpack.c.bf16 %v1057_v21, %v1057_v21  ;;  %v1087_v31 = vmin.f32 %v1023_v24, 6.0  ;;  %1409 = vst.msk [vmem:[%s1964_s30 + $0xf8] sm:$0xf] %vm1346_vm1, %v1671_v25  ;;  %1375 = vst.msk [vmem:[%s1964_s30 + $0x70] sm:$0xf] %vm1346_vm1, %v1637_v41 }
 0x13a   : > { %v1672_v45 = vpack.c.bf16 %v1089_v42, %v1089_v42  ;;  %v1638_v46 = vpack.c.bf16 %v1055_v30, %v1055_v30  ;;  %1407 = vst.msk [vmem:[%s1964_s30 + $0xf0] sm:$0xf] %vm1346_vm1, %v1669_v35 }
 0x13b   : > { %1378 = vst.msk [vmem:[%s1964_s30 + $0x7c] sm:$0xf] %vm1346_vm1, %v1640_v44  ;;  %v1670_v47 = vpack.c.bf16 %v1087_v31, %v1087_v31 }
 0x13c   : > { %1410 = vst.msk [vmem:[%s1964_s30 + $0xfc] sm:$0xf] %vm1346_vm1, %v1672_v45  ;;  %1376 = vst.msk [vmem:[%s1964_s30 + $0x74] sm:$0xf] %vm1346_vm1, %v1638_v46 }
 0x13d   : > { %1408 = vst.msk [vmem:[%s1964_s30 + $0xf4] sm:$0xf] %vm1346_vm1, %v1670_v47 }
 0x13e PF: > { %s14_s15 = sadd.s32 1, %s1821_s15  }
 0x13f   : > { %p11_p4 = scmp.ge.s32.totalorder %s14_s15, 6  }
 0x141   :  { %13 = sbr.rel (!%p11_p4) target bundleno = 1 (0x1), region = 66 }

</bundles_post_ra>
